<compile_context>
chip_gen: v6e
topology: v6e:2x2x1
jax: 0.10.0
libtpu: 0.0.40
codegen_flags: <defaults>
</compile_context>

<pallas_src>
import jax
import jax.numpy as jnp
from jax import lax
from jax.experimental import pallas as pl
from jax.experimental.pallas import tpu as pltpu

N_IN_CH, N_OUT_CH, KSIZE = 3, 8, 3
H_IN = W_IN = 30
H_CONV = W_CONV = H_IN - KSIZE + 1      # 28
H_POOL = W_POOL = H_CONV // 2           # 14
SPATIAL = H_POOL * W_POOL               # 196
PATCH = N_IN_CH * KSIZE * KSIZE         # 27
N_OFFSETS = 4                           # 2x2 pool-window offsets
FLAT = N_OUT_CH * SPATIAL               # 1568
N_CLASSES = 5


def _fused_cnn_kernel(pT_ref, wbd_ref, bc_ref, wf3_ref, bf_ref, o_ref):
    """Whole forward for one batch element.

    pT_ref  : (1, 108, 196) transposed im2col (4 pool offsets x 27 taps, spatial cols)
    wbd_ref : (32, 108)     block-diagonal conv weight (one 8x27 block per offset)
    bc_ref  : (8, 1)        conv bias (per output channel)
    wf3_ref : (5, 8, 196)   fc1 weight with the NCHW flatten permutation baked in
    bf_ref  : (5, 1)        fc1 bias
    o_ref   : (1, 5, 1)     logits for this batch element
    """
    # One MXU dot gives conv pre-activations for all 4 pool offsets (row g*8 + co).
    y = jnp.dot(wbd_ref[...], pT_ref[0], preferred_element_type=jnp.float32)  # (32, 196)

    # 4-way max over pool-window offsets (pairwise to bound live ranges).
    m = jnp.maximum(y[:16, :], y[16:, :])     # (16, 196)
    m = jnp.maximum(m[:8, :], m[8:, :])       # (8, 196)

    # bias + ReLU once: max_g relu(y_g + b) == relu(max_g y_g + b).
    pooled = jnp.maximum(m + bc_ref[...], 0.0)                                 # (8, 196)

    # fc1: logits[j] = sum_{c,s} pooled[c, s] * wf3[j, c, s] + bf[j]
    prod = pooled[None, :, :] * wf3_ref[...]                                   # (5, 8, 196)
    red = jnp.sum(jnp.sum(prod, axis=2), axis=1, keepdims=True)                # (5, 1)
    o_ref[...] = (red + bf_ref[...]).reshape(1, N_CLASSES, 1)


def _make_patches_t(x):
    """x: (N, 3, 30, 30) NCHW -> (N, 108, 196) transposed im2col.

    Row g*27 + (c*9 + kh*3 + kw) holds, for pool offset g = dy*2 + dx,
    x[n, c, 2*ph + dy + kh, 2*pw + dx + kw] over columns s = ph*14 + pw.
    """
    n = x.shape[0]
    rows = []
    for dy in range(2):
        for dx in range(2):
            for c in range(N_IN_CH):
                for kh in range(KSIZE):
                    for kw in range(KSIZE):
                        rows.append(
                            x[:, c,
                              dy + kh: dy + kh + 2 * H_POOL: 2,
                              dx + kw: dx + kw + 2 * W_POOL: 2]
                            .reshape(n, SPATIAL))
    return jnp.stack(rows, axis=1)                       # (N, 108, 196)


def prepare_params(params):
    """One-time constant prep (torch-shaped params -> kernel operands)."""
    wc, bc, wf, bf = params                                       # (8,3,3,3),(8,),(5,1568),(5,)
    wc_mat = wc.reshape(N_OUT_CH, PATCH).astype(jnp.float32)      # (8, 27) OIHW-flatten
    wbd = jnp.kron(jnp.eye(N_OFFSETS, dtype=jnp.float32), wc_mat) # (32, 108) block-diag
    bc_col = bc.reshape(N_OUT_CH, 1).astype(jnp.float32)          # (8, 1)
    wf3 = wf.reshape(N_CLASSES, N_OUT_CH, SPATIAL).astype(jnp.float32)  # (5, 8, 196)
    bf_col = bf.reshape(N_CLASSES, 1).astype(jnp.float32)         # (5, 1)
    return wbd, bc_col, wf3, bf_col


@jax.jit
def simple_cnn_forward(x, prepared):
    """x: (N, 3, 30, 30) float32 NCHW; prepared = prepare_params(torch params)."""
    wbd, bc_col, wf3, bf_col = prepared
    n = x.shape[0]
    patches_t = _make_patches_t(x.astype(jnp.float32))            # (N, 108, 196)

    out = pl.pallas_call(
        _fused_cnn_kernel,
        out_shape=jax.ShapeDtypeStruct((n, N_CLASSES, 1), jnp.float32),
        grid=(n,),
        in_specs=[
            pl.BlockSpec((1, N_OFFSETS * PATCH, SPATIAL), lambda i: (i, 0, 0)),
            pl.BlockSpec((N_OFFSETS * N_OUT_CH, N_OFFSETS * PATCH), lambda i: (0, 0)),
            pl.BlockSpec((N_OUT_CH, 1), lambda i: (0, 0)),
            pl.BlockSpec((N_CLASSES, N_OUT_CH, SPATIAL), lambda i: (0, 0, 0)),
            pl.BlockSpec((N_CLASSES, 1), lambda i: (0, 0)),
        ],
        out_specs=pl.BlockSpec((1, N_CLASSES, 1), lambda i: (i, 0, 0)),
        compiler_params=pltpu.CompilerParams(
            dimension_semantics=("parallel",)),
    )(patches_t, wbd, bc_col, wf3, bf_col)

    return out.reshape(n, N_CLASSES)


def reference_forward(x, params):
    """Pure-JAX reference mirroring the PyTorch forward semantics."""
    wc, bc, wf, bf = params
    conv = lax.conv_general_dilated(x, wc, (1, 1), "VALID",
                                    dimension_numbers=("NCHW", "OIHW", "NCHW"))
    conv = conv + bc.reshape(1, -1, 1, 1)
    act = jnp.maximum(conv, 0.0)
    pooled = lax.reduce_window(act, -jnp.inf, lax.max,
                               (1, 1, 2, 2), (1, 1, 2, 2), "VALID")
    flat = pooled.reshape(x.shape[0], -1)
    flat = jnp.maximum(flat, 0.0)
    return flat @ wf.T + bf


if __name__ == "__main__":
    key = jax.random.PRNGKey(0)
    kx, kwc, kbc, kwf, kbf = jax.random.split(key, 5)

    # batch=2, 3 input channels, 30x30 spatial (required by Linear(1568, 5))
    x = jax.random.normal(kx, (2, 3, 30, 30), dtype=jnp.float32)

    # deterministic synthetic parameters matching the nn.Module shapes
    wc = jax.random.normal(kwc, (8, 3, 3, 3), dtype=jnp.float32) * 0.1   # conv weight
    bc = jax.random.normal(kbc, (8,), dtype=jnp.float32) * 0.1           # conv bias
    wf = jax.random.normal(kwf, (5, 1568), dtype=jnp.float32) * 0.02     # fc1 weight
    bf = jax.random.normal(kbf, (5,), dtype=jnp.float32) * 0.02          # fc1 bias
    params = (wc, bc, wf, bf)

    prepared = prepare_params(params)     # constant weight prep, done once
    out = simple_cnn_forward(x, prepared)
    out = jax.block_until_ready(out)

    ref = reference_forward(x, params)
    assert out.shape == (2, 5), out.shape
    assert jnp.allclose(out, ref, rtol=1e-4, atol=1e-4), (out, ref)
    print("KERNEL_OK")
</pallas_src>

<mosaic_0001>
module attributes {stable_mosaic.version = 11 : i64} {
  func.func @_fused_cnn_kernel(%arg0: i32, %arg1: memref<1x108x196xf32, #tpu.memory_space<vmem>>, %arg2: memref<32x108xf32, #tpu.memory_space<vmem>>, %arg3: memref<8x1xf32, #tpu.memory_space<vmem>>, %arg4: memref<5x8x196xf32, #tpu.memory_space<vmem>>, %arg5: memref<5x1xf32, #tpu.memory_space<vmem>>, %arg6: memref<1x5x1xf32, #tpu.memory_space<vmem>>) attributes {dimension_semantics = [#tpu.dimension_semantics<parallel>], iteration_bounds = array<i64: 2>, scalar_prefetch = 0 : i64, scratch_operands = 0 : i64, tpu.core_type = #tpu.core_type<tc>, window_params = [{transform_indices = @transform_0, window_bounds = array<i64: 1, 108, 196>}, {pipeline_mode = #tpu.pipeline_mode<synchronous>, transform_indices = @transform_1, window_bounds = array<i64: 32, 108>}, {pipeline_mode = #tpu.pipeline_mode<synchronous>, transform_indices = @transform_2, window_bounds = array<i64: 8, 1>}, {pipeline_mode = #tpu.pipeline_mode<synchronous>, transform_indices = @transform_3, window_bounds = array<i64: 5, 8, 196>}, {pipeline_mode = #tpu.pipeline_mode<synchronous>, transform_indices = @transform_4, window_bounds = array<i64: 5, 1>}, {transform_indices = @transform_5, window_bounds = array<i64: 1, 5, 1>}]} {
    %c0 = arith.constant 0 : index
    %c0_0 = arith.constant 0 : index
    %0 = vector.load %arg2[%c0, %c0_0] : memref<32x108xf32, #tpu.memory_space<vmem>>, vector<32x108xf32>
    %c0_1 = arith.constant 0 : index
    %c0_2 = arith.constant 0 : index
    %c0_3 = arith.constant 0 : index
    %1 = vector.load %arg1[%c0_1, %c0_2, %c0_3] : memref<1x108x196xf32, #tpu.memory_space<vmem>>, vector<1x108x196xf32>
    %2 = vector.shape_cast %1 : vector<1x108x196xf32> to vector<108x196xf32>
    %cst = arith.constant dense<0.000000e+00> : vector<32x196xf32>
    %3 = tpu.matmul %0, %2, %cst {dimension_numbers = #tpu.dot_dimension_numbers<[1], [0], [0], [1], [0, 0, 1, 1], [], []>} : vector<32x108xf32>, vector<108x196xf32>, vector<32x196xf32> -> vector<32x196xf32>
    %4 = vector.extract_strided_slice %3 {offsets = [0, 0], sizes = [16, 196], strides = [1, 1]} : vector<32x196xf32> to vector<16x196xf32>
    %5 = vector.extract_strided_slice %3 {offsets = [16, 0], sizes = [16, 196], strides = [1, 1]} : vector<32x196xf32> to vector<16x196xf32>
    %6 = arith.maximumf %4, %5 : vector<16x196xf32>
    %7 = vector.extract_strided_slice %6 {offsets = [0, 0], sizes = [8, 196], strides = [1, 1]} : vector<16x196xf32> to vector<8x196xf32>
    %8 = vector.extract_strided_slice %6 {offsets = [8, 0], sizes = [8, 196], strides = [1, 1]} : vector<16x196xf32> to vector<8x196xf32>
    %9 = arith.maximumf %7, %8 : vector<8x196xf32>
    %c0_4 = arith.constant 0 : index
    %c0_5 = arith.constant 0 : index
    %10 = vector.load %arg3[%c0_4, %c0_5] : memref<8x1xf32, #tpu.memory_space<vmem>>, vector<8x1xf32>
    %11 = vector.broadcast %10 : vector<8x1xf32> to vector<8x196xf32>
    %12 = arith.addf %9, %11 : vector<8x196xf32>
    %cst_6 = arith.constant 0.000000e+00 : f32
    %13 = vector.broadcast %cst_6 : f32 to vector<8x196xf32>
    %14 = arith.maximumf %12, %13 : vector<8x196xf32>
    %15 = vector.shape_cast %14 : vector<8x196xf32> to vector<1x8x196xf32>
    %c0_7 = arith.constant 0 : index
    %c0_8 = arith.constant 0 : index
    %c0_9 = arith.constant 0 : index
    %16 = vector.load %arg4[%c0_7, %c0_8, %c0_9] : memref<5x8x196xf32, #tpu.memory_space<vmem>>, vector<5x8x196xf32>
    %17 = vector.broadcast %15 : vector<1x8x196xf32> to vector<5x8x196xf32>
    %18 = arith.mulf %17, %16 : vector<5x8x196xf32>
    %cst_10 = arith.constant dense<0.000000e+00> : vector<5x8xf32>
    %19 = vector.multi_reduction <add>, %18, %cst_10 [2] : vector<5x8x196xf32> to vector<5x8xf32>
    %cst_11 = arith.constant dense<0.000000e+00> : vector<5xf32>
    %20 = vector.multi_reduction <add>, %19, %cst_11 [1] : vector<5x8xf32> to vector<5xf32>
    %21 = vector.shape_cast %20 : vector<5xf32> to vector<5x1xf32>
    %c0_12 = arith.constant 0 : index
    %c0_13 = arith.constant 0 : index
    %22 = vector.load %arg5[%c0_12, %c0_13] : memref<5x1xf32, #tpu.memory_space<vmem>>, vector<5x1xf32>
    %23 = arith.addf %21, %22 : vector<5x1xf32>
    %24 = vector.shape_cast %23 : vector<5x1xf32> to vector<1x5x1xf32>
    %c0_14 = arith.constant 0 : index
    %c0_15 = arith.constant 0 : index
    %c0_16 = arith.constant 0 : index
    %25 = vector.load %arg6[%c0_14, %c0_15, %c0_16] : memref<1x5x1xf32, #tpu.memory_space<vmem>>, vector<1x5x1xf32>
    tpu.vector_store %arg6[%c0_14, %c0_15, %c0_16], %24 {strides = array<i32>} : memref<1x5x1xf32, #tpu.memory_space<vmem>>, vector<1x5x1xf32>,
    return
  }
  func.func @transform_0(%arg0: i32) -> (i32, i32, i32) {
    %c0_i32 = arith.constant 0 : i32
    %c0_i32_0 = arith.constant 0 : i32
    %c0_i32_1 = arith.constant 0 : i32
    return %arg0, %c0_i32, %c0_i32_0 : i32, i32, i32
  }
  func.func @transform_1(%arg0: i32) -> (i32, i32) {
    %c0_i32 = arith.constant 0 : i32
    %c0_i32_0 = arith.constant 0 : i32
    %c0_i32_1 = arith.constant 0 : i32
    return %c0_i32, %c0_i32_0 : i32, i32
  }
  func.func @transform_2(%arg0: i32) -> (i32, i32) {
    %c0_i32 = arith.constant 0 : i32
    %c0_i32_0 = arith.constant 0 : i32
    %c0_i32_1 = arith.constant 0 : i32
    return %c0_i32, %c0_i32_0 : i32, i32
  }
  func.func @transform_3(%arg0: i32) -> (i32, i32, i32) {
    %c0_i32 = arith.constant 0 : i32
    %c0_i32_0 = arith.constant 0 : i32
    %c0_i32_1 = arith.constant 0 : i32
    %c0_i32_2 = arith.constant 0 : i32
    return %c0_i32, %c0_i32_0, %c0_i32_1 : i32, i32, i32
  }
  func.func @transform_4(%arg0: i32) -> (i32, i32) {
    %c0_i32 = arith.constant 0 : i32
    %c0_i32_0 = arith.constant 0 : i32
    %c0_i32_1 = arith.constant 0 : i32
    return %c0_i32, %c0_i32_0 : i32, i32
  }
  func.func @transform_5(%arg0: i32) -> (i32, i32, i32) {
    %c0_i32 = arith.constant 0 : i32
    %c0_i32_0 = arith.constant 0 : i32
    %c0_i32_1 = arith.constant 0 : i32
    return %arg0, %c0_i32, %c0_i32_0 : i32, i32, i32
  }
}

</mosaic_0001>

<bundles_post_ra>
// kernel: squeeze.0
= control target key start
LH: loop header
LB: loop body
LE: loop exit
PB: predicated region body
PF: predicated region fallthrough
CT: control target
= control target key end

     0   :  { %s7_s6 = smov 3  ;;  %s10_s7 = smov 3  ;;  %vm12_vm0 = vcmask 15360   ;;  %vm4_vm1 = vcmask 113664   ;;  %vm16_vm2 = vcmask 97280   ;;  %vm19_vm3 = vcmask 1048560   ;;  %s249_s0 = inlined_call_operand.vmem [shape: f32[2,1,14,14], index: 0, kind: input, shape index: {}]   ;;  %s250_s1 = inlined_call_operand.vmem [shape: f32[2,1,196], index: 1, kind: output, shape index: {}]  }
   0x1   :  { %v139_v0 = vld [vmem:[%s249_s0 + $0x9] ss:$16 sm:%s7_s6]   ;;  %s29_s12 = smov 3  ;;  %s22_s15 = smov 3  ;;  %vm26_vm4 = vcmask 1032064   ;;  %vm33_vm5 = vcmask 917264  }
   0x2   :  { %v140_v1 = vld [vmem:[%s249_s0 + $0x9] ss:$16 sm:%s10_s7]   ;;  %v142_v3 = vld [vmem:[%s249_s0 + $0x7] ss:$16 sm:%s29_s12]   ;;  %s169_s16 = smov 126   ;;  %s170_s17 = smov 98  }
   0x3   :  { %v13_v2 = vsel %vm12_vm0, %v140_v1, %v139_v0  ;;  %31 = vrot.lane.b32.xlu1 %v142_v3, %s170_s17  ;;  %s36_s18 = smov 3  ;;  %v141_v4 = vld [vmem:[%s249_s0 + $0x8] ss:$16 sm:%s22_s15]   ;;  %s43_s23 = smov 3  ;;  %vm40_vm6 = vcmask 802464   ;;  %vm47_vm7 = vcmask 687664  }
   0x4   :  { %14 = vrot.lane.b32.xlu0 %v13_v2, %s169_s16  ;;  %v143_v5 = vld [vmem:[%s249_s0 + $0x6] ss:$16 sm:%s36_s18]   ;;  %s50_s24 = smov 3  ;;  %s171_s25 = smov 112   ;;  %vm54_vm8 = vcmask 572864   ;;  %vm61_vm9 = vcmask 556464  }
   0x5   :  { %s172_s26 = smov 84   ;;  %v144_v6 = vld [vmem:[%s249_s0 + $0x5] ss:$16 sm:%s43_s23]   ;;  %v145_v7 = vld [vmem:[%s249_s0 + $0x4] ss:$16 sm:%s50_s24]   ;;  %s57_s2 = smov 3 }
   0x6   :  { %s65_s3 = smov 3  ;;  %s173_s4 = smov 70   ;;  %v146_v8 = vld [vmem:[%s249_s0 + $0xd] ss:$16 sm:%s57_s2]   ;;  %vm69_vm10 = vcmask 458064   ;;  %vm76_vm11 = vcmask 441664  }
   0x7   :  { %38 = vrot.lane.b32.xlu1 %v143_v5, %s172_s26  ;;  %s174_s5 = smov 56   ;;  %v147_v9 = vld [vmem:[%s249_s0 + $0x3] ss:$16 sm:%s65_s3]   ;;  %s72_s10 = smov 3  ;;  %vm84_vm12 = vcmask 343264   ;;  %vm91_vm13 = vcmask 326864  }
   0x8   :  { %24 = vrot.lane.b32.xlu0 %v141_v4, %s171_s25  ;;  %s80_s11 = smov 3  ;;  %s2_s12 = smov 3  ;;  %v148_v11 = vld [vmem:[%s249_s0 + $0xc] ss:$16 sm:%s72_s10]   ;;  %vm99_vm14 = vcmask 228464   ;;  %vm106_vm15 = vcmask 212064  }
   0x9   :  { %v3_v10 = vld [vmem:[%s249_s0] ss:$16 sm:%s2_s12]   ;;  %s175_s15 = smov 54   ;;  %s176_s16 = smov 42   ;;  %v149_v12 = vld [vmem:[%s249_s0 + $0x2] ss:$16 sm:%s80_s11]  }
   0xa   :  { %5 = vst.msk [vmem:[#allocation0] ss:$16 sm:$0x3] %vm4_vm1, %v3_v10   ;;  %s87_s21 = smov 3  ;;  %s95_s22 = smov 3 }
   0xb   :  { %52 = vrot.lane.b32.xlu1 %v145_v7, %s174_s5  ;;  %s177_s23 = smov 40   ;;  %s178_s24 = smov 28   ;;  %v150_v13 = vld [vmem:[%s249_s0 + $0xb] ss:$16 sm:%s87_s21]  }
   0xc   :  { %45 = vrot.lane.b32.xlu0 %v144_v6, %s173_s4  ;;  %v151_v14 = vld [vmem:[%s249_s0 + $0x1] ss:$16 sm:%s95_s22]   ;;  %s102_s29 = smov 3  ;;  %s179_s30 = smov 26  }
   0xd   :  { %s180_s2 = smov 14   ;;  %v152_v15 = vld [vmem:[%s249_s0 + $0xa] ss:$16 sm:%s102_s29]   ;;  %s181_s0 = smov 12  }
   0xf   :  { %67 = vrot.lane.b32.xlu1 %v147_v9, %s176_s16 }
  0x10   :  { %59 = vrot.lane.b32.xlu0 %v146_v8, %s175_s15 }
  0x13   :  { %82 = vrot.lane.b32.xlu1 %v149_v12, %s178_s24 }
  0x14   :  { %74 = vrot.lane.b32.xlu0 %v148_v11, %s177_s23 }
  0x17   :  { %97 = vrot.lane.b32.xlu1 %v151_v14, %s180_s2 }
  0x18   :  { %89 = vrot.lane.b32.xlu0 %v150_v13, %s179_s30 }
  0x1c   :  { %104 = vrot.lane.b32.xlu0 %v152_v15, %s181_s0 }
  0x75   :  { %v32_v17 = vpop.permute.xlu1 %31  }
  0x76   :  { %v15_v16 = vpop.permute.xlu0 %14  }
  0x77   :  { %18 = vst.msk [vmem:[#allocation0 + $0x8] ss:$16 sm:$0x3] %vm16_vm2, %v15_v16  }
  0x78   :  { %20 = vst.msk [vmem:[#allocation0] ss:$16 sm:$0x3] %vm19_vm3, %v15_v16  }
  0x79   :  { %v39_v19 = vpop.permute.xlu1 %38  }
  0x7a   :  { %v25_v18 = vpop.permute.xlu0 %24  }
  0x7b   :  { %27 = vst.msk [vmem:[#allocation0] ss:$16 sm:$0x3] %vm26_vm4, %v25_v18  }
  0x7c   :  { %34 = vst.msk [vmem:[#allocation0] ss:$16 sm:$0x3] %vm33_vm5, %v32_v17  }
  0x7d   :  { %41 = vst.msk [vmem:[#allocation0] ss:$16 sm:$0x3] %vm40_vm6, %v39_v19   ;;  %v53_v21 = vpop.permute.xlu1 %52  }
  0x7e   :  { %v46_v20 = vpop.permute.xlu0 %45  }
  0x7f   :  { %48 = vst.msk [vmem:[#allocation0] ss:$16 sm:$0x3] %vm47_vm7, %v46_v20  }
  0x80   :  { %55 = vst.msk [vmem:[#allocation0] ss:$16 sm:$0x3] %vm54_vm8, %v53_v21  }
  0x81   :  { %v68_v23 = vpop.permute.xlu1 %67  }
  0x82   :  { %v60_v22 = vpop.permute.xlu0 %59   ;;  %70 = vst.msk [vmem:[#allocation0] ss:$16 sm:$0x3] %vm69_vm10, %v68_v23  }
  0x83   :  { %63 = vst.msk [vmem:[#allocation0 + $0x8] ss:$16 sm:$0x3] %vm61_vm9, %v60_v22  }
  0x85   :  { %v83_v25 = vpop.permute.xlu1 %82  }
  0x86   :  { %v75_v24 = vpop.permute.xlu0 %74   ;;  %85 = vst.msk [vmem:[#allocation0] ss:$16 sm:$0x3] %vm84_vm12, %v83_v25  }
  0x87   :  { %78 = vst.msk [vmem:[#allocation0 + $0x8] ss:$16 sm:$0x3] %vm76_vm11, %v75_v24  }
  0x89   :  { %v98_v27 = vpop.permute.xlu1 %97  }
  0x8a   :  { %v90_v26 = vpop.permute.xlu0 %89   ;;  %100 = vst.msk [vmem:[#allocation0] ss:$16 sm:$0x3] %vm99_vm14, %v98_v27  }
  0x8b   :  { %93 = vst.msk [vmem:[#allocation0 + $0x8] ss:$16 sm:$0x3] %vm91_vm13, %v90_v26  }
  0x8e   :  { %v105_v28 = vpop.permute.xlu0 %104  }
  0x8f   :  { %108 = vst.msk [vmem:[#allocation0 + $0x8] ss:$16 sm:$0x3] %vm106_vm15, %v105_v28  }
  0x91   :  { %v113_v29 = vld [vmem:[#allocation0] sm:$0x1]  ;;  %v124_v30 = vld [vmem:[#allocation0 + $0x10] sm:$0x1] }
  0x92   :  { %116 = vst [vmem:[%s250_s1] sm:$0x1] %v113_v29  ;;  %154 = vst [vmem:[%s250_s1 + $0x2] sm:$0x1] %v124_v30 }
  0x96   :  { %v118_v31 = vld [vmem:[#allocation0 + $0x8] sm:$0x1]  ;;  %v131_v32 = vld [vmem:[#allocation0 + $0x18] sm:$0x1] }
  0x97   :  { %153 = vst [vmem:[%s250_s1 + $0x1] sm:$0x1] %v118_v31  ;;  %155 = vst [vmem:[%s250_s1 + $0x3] sm:$0x1] %v131_v32 }

// kernel: simple_cnn_forward.1
= control target key start
LH: loop header
LB: loop body
LE: loop exit
PB: predicated region body
PF: predicated region fallthrough
CT: control target
= control target key end

     0   :  { %s613_s18 = smov 0   ;;  %s721_s0 = inlined_call_operand.vmem [shape: f32[2,108,196], index: 0, kind: input, shape index: {}]   ;;  %s722_s1 = inlined_call_operand.vmem [shape: f32[32,108], index: 1, kind: input, shape index: {}]   ;;  %s723_s2 = inlined_call_operand.vmem [shape: f32[8,1], index: 2, kind: input, shape index: {}]   ;;  %s724_s3 = inlined_call_operand.vmem [shape: f32[5,8,196], index: 3, kind: input, shape index: {}]   ;;  %s725_s4 = inlined_call_operand.vmem [shape: f32[5,1], index: 4, kind: input, shape index: {}]   ;;  %s726_s5 = inlined_call_operand.vmem [shape: f32[2,5,1], index: 5, kind: output, shape index: {}]  }
   0x1 LB: > { %s518_s19 = sadd.s32 4294967295, %s579_s18   ;;  %p522_p0 = scmp.ge.s32.totalorder %s579_s18, 1  ;;  %s579_s18 = sphi %s613_s18, %s15_s18  }
   0x2   : > { %p187_p1 = scmp.lt.s32.totalorder %s579_s18, 3 }
   0x4   : > { %p188_p2 = pnand %p522_p0, %p187_p1 }
   0x5   : > { %p214_p3 = scmp.lt.s32.totalorder (!%p188_p2), %s518_s19, 1 }
   0x6   : > { %191 = sbr.rel (%p188_p2) target bundleno = 551 (0x227), region = 40 }
   0xb   : > { %v581_v0 = vmov 0.0   ;;  %v370_v1 = vld [vmem:[%s723_s2] sm:$0xff]  ;;  %s728_s19 = smov (!%p214_p3, %s518_s19), 1  ;;  %v582_v2 = vmov 0   ;;  %vm268_vm0 = vcmask 1043456   ;;  %vm255_vm1 = vcmask 883712  }
   0xc   : > { %339 = vmatprep.mubr.f32.mxu0 %v581_v0  ;;  %351 = vmatprep.mubr.f32.mxu1 %v581_v0  ;;  %s561_s22 = smul.u32 224, %s728_s19  ;;  %v223_v31 = vld [vmem:[%s722_s1] sm:$0xff]  ;;  %v225_v32 = vld [vmem:[%s722_s1 + $0x10] sm:$0xff]  ;;  %v224_v33 = vld [vmem:[%s722_s1 + $0x8] sm:$0xff]  ;;  %vm400_vm2 = vcmask 556032   ;;  %vm448_vm3 = vcmask 1041409  }
   0xd   : > { %572 = vset.pattern.permute.xlu0 %v582_v2  ;;  %v226_v34 = vld [vmem:[%s722_s1 + $0x18] sm:$0xff]  ;;  %v381_v54 = vld [vmem:[%s724_s3 + $0x8] sm:$0xff]  ;;  %v382_v57 = vld [vmem:[%s724_s3 + $0x10] sm:$0xff]  ;;  %vm450_vm4 = vcmask 1042434   ;;  %vm452_vm5 = vcmask 1043459   ;;  %vm454_vm6 = vcmask 1044484  }
   0xe   : > { %373 = vperm.xlu0 %572, %v370_v1   ;;  %s632_s25 = scalar_lea.vmem %s721_s0, %s561_s22  ;;  %v383_v53 = vld [vmem:[%s724_s3 + $0x18] sm:$0xff]  ;;  %v385_v55 = vld [vmem:[%s724_s3 + $0x28] sm:$0xff]  ;;  %v380_v58 = vld [vmem:[%s724_s3] sm:$0xff]  ;;  %vm457_vm7 = vcmask 61440   ;;  %s524_s6 = sshll.u32 %s728_s19, 3  ;;  %vm463_vm8 = vcmask 4096  }
   0xf   : > { %v254_v3 = vld [vmem:[%s632_s25 + $0xd8] sm:$0xf]  ;;  %v253_v4 = vld [vmem:[%s632_s25 + $0xd0] sm:$0xf]  ;;  %v252_v5 = vld [vmem:[%s632_s25 + $0xc8] sm:$0xff]  ;;  %s222_s11 = scalar_lea.vmem %s726_s5, %s524_s6 }
  0x10   : > { %525 = vmatprep.subr.msk.mxu0 %vm268_vm0, %v254_v3  ;;  %533 = vmatprep.subr.msk.mxu1 %vm268_vm0, %v254_v3  ;;  %v251_v6 = vld [vmem:[%s632_s25 + $0xc0] sm:$0xff]  ;;  %v250_v7 = vld [vmem:[%s632_s25 + $0xb8] sm:$0xff]  ;;  %v249_v8 = vld [vmem:[%s632_s25 + $0xb0] sm:$0xff] }
  0x11   : > { %526 = vmatpush1.msk.msra.mxu0 %vm268_vm0, %v253_v4  ;;  %547 = vmatpush1.msk.msra.mxu1 %vm268_vm0, %v253_v4  ;;  %v248_v9 = vld [vmem:[%s632_s25 + $0xa8] sm:$0xff]  ;;  %v247_v10 = vld [vmem:[%s632_s25 + $0xa0] sm:$0xff]  ;;  %v246_v11 = vld [vmem:[%s632_s25 + $0x98] sm:$0xff] }
  0x12   : > { %281 = vmatprep.subr.mxu0 %v252_v5  ;;  %534 = vmatprep.subr.mxu1 %v252_v5  ;;  %v245_v12 = vld [vmem:[%s632_s25 + $0x90] sm:$0xff]  ;;  %v244_v13 = vld [vmem:[%s632_s25 + $0x88] sm:$0xff]  ;;  %v243_v14 = vld [vmem:[%s632_s25 + $0x80] sm:$0xff] }
  0x13   : > { %282 = vmatpush1.msra.mxu0 %v251_v6  ;;  %548 = vmatpush1.msra.mxu1 %v251_v6  ;;  %v242_v15 = vld [vmem:[%s632_s25 + $0x78] sm:$0xff]  ;;  %v241_v16 = vld [vmem:[%s632_s25 + $0x70] sm:$0xff]  ;;  %v240_v17 = vld [vmem:[%s632_s25 + $0x68] sm:$0xff] }
  0x14   : > { %283 = vmatprep.subr.mxu0 %v250_v7  ;;  %535 = vmatprep.subr.mxu1 %v250_v7  ;;  %v239_v18 = vld [vmem:[%s632_s25 + $0x60] sm:$0xff]  ;;  %v238_v19 = vld [vmem:[%s632_s25 + $0x58] sm:$0xff]  ;;  %v237_v20 = vld [vmem:[%s632_s25 + $0x50] sm:$0xff] }
  0x15   : > { %284 = vmatpush1.msra.mxu0 %v249_v8  ;;  %549 = vmatpush1.msra.mxu1 %v249_v8  ;;  %v236_v21 = vld [vmem:[%s632_s25 + $0x48] sm:$0xff]  ;;  %v235_v22 = vld [vmem:[%s632_s25 + $0x40] sm:$0xff]  ;;  %v234_v23 = vld [vmem:[%s632_s25 + $0x38] sm:$0xff] }
  0x16   : > { %285 = vmatprep.subr.mxu0 %v248_v9  ;;  %536 = vmatprep.subr.mxu1 %v248_v9  ;;  %v233_v24 = vld [vmem:[%s632_s25 + $0x30] sm:$0xff]  ;;  %v232_v25 = vld [vmem:[%s632_s25 + $0x28] sm:$0xff]  ;;  %v231_v26 = vld [vmem:[%s632_s25 + $0x20] sm:$0xff] }
  0x17   : > { %286 = vmatpush1.msra.mxu0 %v247_v10  ;;  %550 = vmatpush1.msra.mxu1 %v247_v10  ;;  %v230_v27 = vld [vmem:[%s632_s25 + $0x18] sm:$0xff]  ;;  %v229_v28 = vld [vmem:[%s632_s25 + $0x10] sm:$0xff]  ;;  %v228_v29 = vld [vmem:[%s632_s25 + $0x8] sm:$0xff] }
  0x18   : > { %287 = vmatprep.subr.mxu0 %v246_v11  ;;  %537 = vmatprep.subr.mxu1 %v246_v11  ;;  %v227_v30 = vld [vmem:[%s632_s25] sm:$0xff]  ;;  %v389_v9 = vld [vmem:[%s724_s3 + $0x48] sm:$0xff]  ;;  %v386_v10 = vld [vmem:[%s724_s3 + $0x30] sm:$0xff] }
  0x19   : > { %288 = vmatpush1.msra.mxu0 %v245_v12  ;;  %551 = vmatpush1.msra.mxu1 %v245_v12  ;;  %v384_v3 = vld [vmem:[%s724_s3 + $0x20] sm:$0xff] }
  0x1a   : > { %289 = vmatprep.subr.mxu0 %v244_v13  ;;  %538 = vmatprep.subr.mxu1 %v244_v13 }
  0x1b   : > { %290 = vmatpush1.msra.mxu0 %v243_v14  ;;  %552 = vmatpush1.msra.mxu1 %v243_v14 }
  0x1c   : > { %291 = vmatprep.subr.mxu0 %v242_v15  ;;  %539 = vmatprep.subr.mxu1 %v242_v15  ;;  %v388_v15 = vld [vmem:[%s724_s3 + $0x40] sm:$0xff] }
  0x1d   : > { %292 = vmatpush1.msra.mxu0 %v241_v16  ;;  %553 = vmatpush1.msra.mxu1 %v241_v16 }
  0x1e   : > { %293 = vmatprep.subr.mxu0 %v240_v17  ;;  %540 = vmatprep.subr.mxu1 %v240_v17 }
  0x1f   : > { %294 = vmatpush1.msra.mxu0 %v239_v18  ;;  %554 = vmatpush1.msra.mxu1 %v239_v18 }
  0x20   : > { %295 = vmatprep.subr.mxu0 %v238_v19  ;;  %541 = vmatprep.subr.mxu1 %v238_v19 }
  0x21   : > { %296 = vmatpush1.msra.mxu0 %v237_v20  ;;  %555 = vmatpush1.msra.mxu1 %v237_v20  ;;  %v426_v20 = vlaneseq }
  0x22   : > { %297 = vmatprep.subr.mxu0 %v236_v21  ;;  %542 = vmatprep.subr.mxu1 %v236_v21 }
  0x23   : > { %298 = vmatpush1.msra.mxu0 %v235_v22  ;;  %556 = vmatpush1.msra.mxu1 %v235_v22  ;;  %v427_v21 = vand.u32 127, %v426_v20  ;;  %v429_v22 = vshrl.u32 %v426_v20, 7 }
  0x24   : > { %299 = vmatprep.subr.mxu0 %v234_v23  ;;  %543 = vmatprep.subr.mxu1 %v234_v23 }
  0x25   : > { %300 = vmatpush1.msra.mxu0 %v233_v24  ;;  %557 = vmatpush1.msra.mxu1 %v233_v24  ;;  %v430_v24 = vsub.s32 %v427_v21, %v429_v22 }
  0x26   : > { %301 = vmatprep.subr.mxu0 %v232_v25  ;;  %544 = vmatprep.subr.mxu1 %v232_v25 }
  0x27   : > { %302 = vmatpush1.msra.mxu0 %v231_v26  ;;  %558 = vmatpush1.msra.mxu1 %v231_v26 }
  0x28   : > { %303 = vmatprep.subr.mxu0 %v230_v27  ;;  %545 = vmatprep.subr.mxu1 %v230_v27 }
  0x29   : > { %304 = vmatpush1.msra.mxu0 %v229_v28  ;;  %559 = vmatpush1.msra.mxu1 %v229_v28 }
  0x2a   : > { %305 = vmatprep.subr.mxu0 %v228_v29  ;;  %546 = vmatprep.subr.mxu1 %v228_v29 }
  0x2b   : > { %306 = vmatpush1.msra.mxu0 %v227_v30  ;;  %560 = vmatpush1.msra.mxu1 %v227_v30 }
  0x2c   : > { %527 = vmatmul.mubr.msk.f32.vlgmr.msra.gmra.mxu0 %vm255_vm1, %v223_v31  ;;  %529 = vmatmul.mubr.msk.f32.vlgmr.msra.gmra.mxu1 %vm255_vm1, %v225_v32 }
  0x2d   : > { %345 = vmatprep.mubr.f32.mxu0 %v581_v0  ;;  %357 = vmatprep.mubr.f32.mxu1 %v581_v0  ;;  %v387_v0 = vld [vmem:[%s724_s3 + $0x38] sm:$0xff] }
  0x30   : > { %528 = vmatmul.mubr.msk.f32.gmra.mxu0 %vm255_vm1, %v224_v33  ;;  %530 = vmatmul.mubr.msk.f32.gmra.mxu1 %vm255_vm1, %v226_v34 }
  0x89   : > { %v374_v43 = vpop.permute.xlu0 %373 }
  0xec   : > { %v341_v35 = vpop.f32.mrf.mxu0  ;;  %v353_v36 = vpop.f32.mrf.mxu1 }
  0xed   : > { %v364_v41 = vmax.f32 %v341_v35, %v353_v36 }
  0xee   : > { %v343_v37 = vpop.f32.mrf.mxu0  ;;  %v355_v38 = vpop.f32.mrf.mxu1 }
  0xef   : > { %v365_v46 = vmax.f32 %v343_v37, %v355_v38 }
  0xf0   : > { %v347_v39 = vpop.f32.mrf.mxu0  ;;  %v359_v40 = vpop.f32.mrf.mxu1 }
  0xf1   : > { %v366_v42 = vmax.f32 %v347_v39, %v359_v40  ;;  %v461_v39 = vld [vmem:[%s725_s4] sm:$0x1f] }
  0xf2   : > { %v349_v44 = vpop.f32.mrf.mxu0  ;;  %v361_v45 = vpop.f32.mrf.mxu1 }
  0xf3   : > { %v368_v47 = vmax.f32 %v364_v41, %v366_v42  ;;  %v367_v48 = vmax.f32 %v349_v44, %v361_v45 }
  0xf5   : > { %v369_v49 = vmax.f32 %v365_v46, %v367_v48  ;;  %v376_v50 = vadd.f32 %v374_v43, %v368_v47 }
  0xf7   : > { %v377_v51 = vadd.f32 %v374_v43, %v369_v49  ;;  %v378_v52 = vmax.f32 %v376_v50, 0.0 }
  0xf9   : > { %v379_v56 = vmax.f32 %v377_v51, 0.0  ;;  %v392_v62 = vmul.f32 %v382_v57, %v378_v52  ;;  %v390_v63 = vmul.f32 %v380_v58, %v378_v52  ;;  %v394_v8 = vmul.f32 %v384_v3, %v378_v52 }
  0xfa   : > { %v396_v14 = vmul.f32 %v386_v10, %v378_v52  ;;  %v398_v18 = vmul.f32 %v388_v15, %v378_v52 }
  0xfb   : > { %v393_v59 = vmul.f32 %v383_v53, %v379_v56  ;;  %v391_v60 = vmul.f32 %v381_v54, %v379_v56  ;;  %v395_v61 = vmul.f32 %v385_v55, %v379_v56  ;;  %v397_v7 = vmul.f32 %v387_v0, %v379_v56 }
  0xfc   : > { %v399_v13 = vmul.f32 %v389_v9, %v379_v56 }
  0xfd   : > { %v405_v1 = vsel %vm400_vm2, %v393_v59, 0.0  ;;  %v401_v2 = vsel %vm400_vm2, %v391_v60, 0.0  ;;  %v409_v6 = vsel %vm400_vm2, %v395_v61, 0.0  ;;  %v413_v12 = vsel %vm400_vm2, %v397_v7, 0.0 }
  0xfe   : > { %v406_v4 = vadd.f32 %v405_v1, %v392_v62  ;;  %v402_v5 = vadd.f32 %v401_v2, %v390_v63  ;;  %v410_v11 = vadd.f32 %v409_v6, %v394_v8  ;;  %v414_v16 = vadd.f32 %v413_v12, %v396_v14 }
  0xff   : > { %v417_v17 = vsel %vm400_vm2, %v399_v13, 0.0 }
 0x100   : > { %407 = vadd.xlane.f32.xlu1 %v406_v4  ;;  %403 = vadd.xlane.f32.xlu0 %v402_v5  ;;  %v418_v19 = vadd.f32 %v417_v17, %v398_v18 }
 0x104   : > { %411 = vadd.xlane.f32.xlu1 %v410_v11 }
 0x108   : > { %415 = vadd.xlane.f32.xlu1 %v414_v16 }
 0x10c   : > { %419 = vadd.xlane.f32.xlu1 %v418_v19 }
 0x189   : > { %v408_v23 = vpop.xlane.xlu1 %407  ;;  %v404_v26 = vpop.xlane.xlu0 %403 }
 0x18a   : > { %v435_v27 = vrot.slane %v408_v23, %v430_v24  ;;  %v431_v28 = vrot.slane %v404_v26, %v430_v24 }
 0x18c   : > { %v449_v32 = vsel %vm448_vm3, %v435_v27, %v431_v28 }
 0x18d   : > { %v412_v25 = vpop.xlane.xlu1 %411 }
 0x18e   : > { %v439_v30 = vrot.slane %v412_v25, %v430_v24 }
 0x190   : > { %v451_v34 = vsel %vm450_vm4, %v439_v30, %v449_v32 }
 0x191   : > { %v416_v29 = vpop.xlane.xlu1 %415 }
 0x192   : > { %v443_v31 = vrot.slane %v416_v29, %v430_v24 }
 0x194   : > { %v453_v36 = vsel %vm452_vm5, %v443_v31, %v451_v34 }
 0x195   : > { %v420_v33 = vpop.xlane.xlu1 %419 }
 0x196   : > { %v447_v35 = vrot.slane %v420_v33, %v430_v24 }
 0x198   : > { %v455_v37 = vsel %vm454_vm6, %v447_v35, %v453_v36 }
 0x199   : > { %v458_v38 = vsel %vm457_vm7, %v455_v37, 0.0 }
 0x19a   : > { %459 = vadd.xlane.f32.xlu1 %v458_v38 }
 0x223   : > { %v460_v40 = vpop.xlane.xlu1 %459 }
 0x224   : > { %v462_v41 = vadd.f32 %v461_v39, %v460_v40 }
 0x226   : > { %464 = vst.msk [vmem:[%s222_s11] sm:$0x1f] %vm463_vm8, %v462_v41 }
 0x227 PF: > { %s15_s18 = sadd.s32 1, %s579_s18  }
 0x228   : > { %p12_p4 = scmp.ge.s32.totalorder %s15_s18, 4  }
 0x22a   :  { %14 = sbr.rel (!%p12_p4) target bundleno = 1 (0x1), region = 70 }

</bundles_post_ra>
